<compile_context>
chip_gen: v6e
topology: v6e:2x2x1
jax: 0.10.0
libtpu: 0.0.40
codegen_flags: <defaults>
</compile_context>

<pallas_src>
import functools

import numpy as np
import jax
import jax.numpy as jnp
from jax.experimental import pallas as pl
from jax.experimental.pallas import tpu as pltpu


def _res2block_kernel(xb_ref, w_ref, bias_ref, bn_scale_ref, bn_shift_ref,
                      out_ref, *, n_branch, kernels, dilation, pad):
    """xb_ref:  [n_branch, B*W, T]   branch inputs (chunks 1..scale-1), batch fused
                                     into sublanes (row = b*W + i).
       w_ref:   [n_branch, B*W, K*B*W] block-diag-over-batch, tap-concatenated weights.
       bias_ref / bn_scale_ref / bn_shift_ref: [n_branch, B*W, 1].
       out_ref: [n_branch, B*W, T]   computed branches (chunk 0 handled outside).
    """
    _, BW, T = xb_ref.shape
    K = kernels
    d = dilation

    # Per-tap halo masks (valid source positions), hoisted out of the branch loop.
    t_idx = jax.lax.broadcasted_iota(jnp.int32, (BW, T), 1)
    masks = []
    for k in range(K):
        off = k * d - pad            # source time index = t + off
        if off == 0:
            masks.append(None)
        elif off < 0:
            masks.append(t_idx >= -off)
        else:
            masks.append(t_idx < T - off)

    base = None
    for s in range(n_branch):        # residual chain is inherently sequential
        xi = xb_ref[s] if base is None else xb_ref[s] + base      # [BW, T]

        # im2col over the K dilated taps, built in registers via XLU rolls + masks
        # (zero conv padding == masked halo); no padded VMEM scratch round trips.
        cols = []
        for k in range(K):
            off = k * d - pad
            if off == 0:
                cols.append(xi)
            else:
                rolled = pltpu.roll(xi, shift=(-off) % T, axis=1)
                cols.append(jnp.where(masks[k], rolled, 0.0))
        xcat = jnp.concatenate(cols, axis=0)                       # [K*BW, T]

        # One MXU push per branch: [BW, K*BW] x [K*BW, T] -> [BW, T].
        acc = jnp.dot(w_ref[s], xcat, preferred_element_type=jnp.float32)
        acc = acc + bias_ref[s]                                    # [BW, 1] broadcast
        acc = jnp.maximum(acc, 0.0)                                # ReLU
        base = acc * bn_scale_ref[s] + bn_shift_ref[s]             # fused BN (inference)
        out_ref[s] = base.astype(out_ref.dtype)


def res2block(x, w, b, gamma, beta, mean, var, *, scale, kernels, dilation,
              eps=1e-5):
    """x: [B, C, T] f32.  w: [scale-1, W, W, K] (PyTorch Conv1d OIK layout)."""
    B, C, T = x.shape
    assert C % scale == 0
    width = C // scale
    K = kernels
    d = dilation
    pad = (K - 1) * d // 2
    n_branch = scale - 1
    BW = B * width

    # ---- layout repack: [B, C, T] -> [scale, B*W, T]; drop the pass-through chunk.
    x_br = x.reshape(B, scale, width, T).transpose(1, 0, 2, 3).reshape(scale, BW, T)
    xb = x_br[1:]                                                  # [n_branch, BW, T]

    # ---- fused conv weight: block-diagonal over batch, taps concatenated.
    # Wf[s, p*W+o, k*BW + q*W + i] = eye(B)[p, q] * w[s, o, i, k]
    w_k = jnp.transpose(w, (0, 3, 1, 2))                           # [nb, K, W, W]
    eye_b = jnp.eye(B, dtype=w.dtype)
    wblk = jnp.einsum('pq,skoi->skpoqi', eye_b, w_k)               # [nb,K,B,W,B,W]
    wblk = wblk.reshape(n_branch, K, BW, BW)
    w_fused = wblk.transpose(0, 2, 1, 3).reshape(n_branch, BW, K * BW)

    # ---- bias + fused BatchNorm affine (inference form), tiled over batch rows.
    bn_scale = gamma * jax.lax.rsqrt(var + eps)                    # [nb, W]
    bn_shift = beta - mean * bn_scale                              # [nb, W]
    bias_t = jnp.tile(b, (1, B))[..., None]                        # [nb, BW, 1]
    bn_scale_t = jnp.tile(bn_scale, (1, B))[..., None]             # [nb, BW, 1]
    bn_shift_t = jnp.tile(bn_shift, (1, B))[..., None]             # [nb, BW, 1]

    kern = functools.partial(_res2block_kernel, n_branch=n_branch, kernels=K,
                             dilation=d, pad=pad)
    vmem = lambda: pl.BlockSpec(memory_space=pltpu.MemorySpace.VMEM)
    out_br = pl.pallas_call(
        kern,
        out_shape=jax.ShapeDtypeStruct((n_branch, BW, T), jnp.float32),
        in_specs=[vmem() for _ in range(5)],
        out_specs=vmem(),
    )(xb, w_fused, bias_t, bn_scale_t, bn_shift_t)

    # ---- repack back to [B, C, T] and re-attach the untouched first chunk.
    out_branches = (out_br.reshape(n_branch, B, width, T)
                    .transpose(1, 0, 2, 3)
                    .reshape(B, n_branch * width, T))
    return jnp.concatenate([x[:, :width, :], out_branches], axis=1)


def res2block_reference(x, w, b, gamma, beta, mean, var, *, scale, kernels,
                        dilation, eps=1e-5):
    """Pure-JAX reference mirroring the PyTorch forward (inference-mode BN)."""
    B, C, T = x.shape
    width = C // scale
    pad = (kernels - 1) * dilation // 2
    chunks = [x[:, i * width:(i + 1) * width, :] for i in range(scale)]
    outs = [chunks[0]]
    base = jnp.zeros_like(chunks[0])
    for s in range(scale - 1):
        xi = chunks[s + 1] + base
        y = jax.lax.conv_general_dilated(
            xi, w[s], window_strides=(1,), padding=[(pad, pad)],
            rhs_dilation=(dilation,), dimension_numbers=('NCH', 'OIH', 'NCH'))
        y = y + b[s][None, :, None]
        y = jnp.maximum(y, 0.0)
        y = (y - mean[s][None, :, None]) / jnp.sqrt(var[s][None, :, None] + eps)
        y = y * gamma[s][None, :, None] + beta[s][None, :, None]
        base = y
        outs.append(base)
    return jnp.concatenate(outs, axis=1)


if __name__ == "__main__":
    # Module hyper-params (small, consistent with Res2Block's constraints).
    # B*width = 8 sublanes, T = 128 lanes -> each branch chunk is one (8,128) tile.
    B, channels, T = 2, 16, 128
    scale, kernels, dilation = 4, 3, 2
    width = channels // scale

    key = jax.random.PRNGKey(0)
    kx, kw, kb, kg, kbe, km, kv = jax.random.split(key, 7)

    x = jax.random.normal(kx, (B, channels, T), dtype=jnp.float32)

    # Deterministic synthetic parameters (shapes from nn.Conv1d / nn.BatchNorm1d).
    w = 0.3 * jax.random.normal(kw, (scale - 1, width, width, kernels), jnp.float32)
    b = 0.1 * jax.random.normal(kb, (scale - 1, width), jnp.float32)
    gamma = 1.0 + 0.1 * jax.random.normal(kg, (scale - 1, width), jnp.float32)
    beta = 0.1 * jax.random.normal(kbe, (scale - 1, width), jnp.float32)
    mean = 0.1 * jax.random.normal(km, (scale - 1, width), jnp.float32)
    var = 0.5 + 0.5 * jnp.abs(jax.random.normal(kv, (scale - 1, width), jnp.float32))

    out = res2block(x, w, b, gamma, beta, mean, var,
                    scale=scale, kernels=kernels, dilation=dilation)
    out = jax.block_until_ready(out)

    ref = res2block_reference(x, w, b, gamma, beta, mean, var,
                              scale=scale, kernels=kernels, dilation=dilation)
    ref = jax.block_until_ready(ref)

    np.testing.assert_allclose(np.asarray(out), np.asarray(ref),
                               rtol=1e-4, atol=1e-4)
    print("KERNEL_OK")
</pallas_src>

<mosaic_0001>
module attributes {stable_mosaic.version = 11 : i64} {
  func.func @_res2block_kernel(%arg0: memref<3x8x128xf32, #tpu.memory_space<vmem>>, %arg1: memref<3x8x24xf32, #tpu.memory_space<vmem>>, %arg2: memref<3x8x1xf32, #tpu.memory_space<vmem>>, %arg3: memref<3x8x1xf32, #tpu.memory_space<vmem>>, %arg4: memref<3x8x1xf32, #tpu.memory_space<vmem>>, %arg5: memref<3x8x128xf32, #tpu.memory_space<vmem>>) attributes {dimension_semantics = [], scalar_prefetch = 0 : i64, scratch_operands = 0 : i64, tpu.core_type = #tpu.core_type<tc>} {
    %0 = tpu.iota {dimensions = array<i32: 1>} : vector<8x128xi32>
    %c2_i32 = arith.constant 2 : i32
    %1 = vector.broadcast %c2_i32 : i32 to vector<8x128xi32>
    %2 = arith.cmpi sge, %0, %1 : vector<8x128xi32>
    %c126_i32 = arith.constant 126 : i32
    %3 = vector.broadcast %c126_i32 : i32 to vector<8x128xi32>
    %4 = arith.cmpi slt, %0, %3 : vector<8x128xi32>
    %c0 = arith.constant 0 : index
    %c0_0 = arith.constant 0 : index
    %c0_1 = arith.constant 0 : index
    %5 = vector.load %arg0[%c0, %c0_0, %c0_1] : memref<3x8x128xf32, #tpu.memory_space<vmem>>, vector<1x8x128xf32>
    %6 = vector.shape_cast %5 : vector<1x8x128xf32> to vector<8x128xf32>
    %c2_i32_2 = arith.constant 2 : i32
    %7 = tpu.dynamic_rotate %6 by %c2_i32_2 dim 1 : vector<8x128xf32>, i32 -> vector<8x128xf32>
    %cst = arith.constant 0.000000e+00 : f32
    %8 = vector.broadcast %cst : f32 to vector<8x128xf32>
    %9 = arith.select %2, %7, %8 : vector<8x128xi1>, vector<8x128xf32>
    %c126_i32_3 = arith.constant 126 : i32
    %10 = tpu.dynamic_rotate %6 by %c126_i32_3 dim 1 : vector<8x128xf32>, i32 -> vector<8x128xf32>
    %cst_4 = arith.constant 0.000000e+00 : f32
    %11 = vector.broadcast %cst_4 : f32 to vector<8x128xf32>
    %12 = arith.select %4, %10, %11 : vector<8x128xi1>, vector<8x128xf32>
    %13 = tpu.concatenate %9, %6, %12 in 0 : vector<8x128xf32>, vector<8x128xf32>, vector<8x128xf32> -> vector<24x128xf32>
    %c0_5 = arith.constant 0 : index
    %c0_6 = arith.constant 0 : index
    %c0_7 = arith.constant 0 : index
    %14 = vector.load %arg1[%c0_5, %c0_6, %c0_7] : memref<3x8x24xf32, #tpu.memory_space<vmem>>, vector<1x8x24xf32>
    %15 = vector.shape_cast %14 : vector<1x8x24xf32> to vector<8x24xf32>
    %cst_8 = arith.constant dense<0.000000e+00> : vector<8x128xf32>
    %16 = tpu.matmul %15, %13, %cst_8 {dimension_numbers = #tpu.dot_dimension_numbers<[1], [0], [0], [1], [0, 0, 1, 1], [], []>} : vector<8x24xf32>, vector<24x128xf32>, vector<8x128xf32> -> vector<8x128xf32>
    %c0_9 = arith.constant 0 : index
    %c0_10 = arith.constant 0 : index
    %c0_11 = arith.constant 0 : index
    %17 = vector.load %arg2[%c0_9, %c0_10, %c0_11] : memref<3x8x1xf32, #tpu.memory_space<vmem>>, vector<1x8x1xf32>
    %18 = vector.shape_cast %17 : vector<1x8x1xf32> to vector<8x1xf32>
    %19 = vector.broadcast %18 : vector<8x1xf32> to vector<8x128xf32>
    %20 = arith.addf %16, %19 : vector<8x128xf32>
    %cst_12 = arith.constant 0.000000e+00 : f32
    %21 = vector.broadcast %cst_12 : f32 to vector<8x128xf32>
    %22 = arith.maximumf %20, %21 : vector<8x128xf32>
    %c0_13 = arith.constant 0 : index
    %c0_14 = arith.constant 0 : index
    %c0_15 = arith.constant 0 : index
    %23 = vector.load %arg3[%c0_13, %c0_14, %c0_15] : memref<3x8x1xf32, #tpu.memory_space<vmem>>, vector<1x8x1xf32>
    %24 = vector.shape_cast %23 : vector<1x8x1xf32> to vector<8x1xf32>
    %25 = vector.broadcast %24 : vector<8x1xf32> to vector<8x128xf32>
    %26 = arith.mulf %22, %25 : vector<8x128xf32>
    %c0_16 = arith.constant 0 : index
    %c0_17 = arith.constant 0 : index
    %c0_18 = arith.constant 0 : index
    %27 = vector.load %arg4[%c0_16, %c0_17, %c0_18] : memref<3x8x1xf32, #tpu.memory_space<vmem>>, vector<1x8x1xf32>
    %28 = vector.shape_cast %27 : vector<1x8x1xf32> to vector<8x1xf32>
    %29 = vector.broadcast %28 : vector<8x1xf32> to vector<8x128xf32>
    %30 = arith.addf %26, %29 : vector<8x128xf32>
    %c0_19 = arith.constant 0 : index
    %c0_20 = arith.constant 0 : index
    %c0_21 = arith.constant 0 : index
    %31 = vector.load %arg5[%c0_19, %c0_20, %c0_21] : memref<3x8x128xf32, #tpu.memory_space<vmem>>, vector<1x8x128xf32>
    %32 = vector.shape_cast %31 : vector<1x8x128xf32> to vector<8x128xf32>
    %33 = vector.shape_cast %30 : vector<8x128xf32> to vector<1x8x128xf32>
    tpu.vector_store %arg5[%c0_19, %c0_20, %c0_21], %33 {strides = array<i32>} : memref<3x8x128xf32, #tpu.memory_space<vmem>>, vector<1x8x128xf32>,
    %c1 = arith.constant 1 : index
    %c0_22 = arith.constant 0 : index
    %c0_23 = arith.constant 0 : index
    %34 = vector.load %arg0[%c1, %c0_22, %c0_23] : memref<3x8x128xf32, #tpu.memory_space<vmem>>, vector<1x8x128xf32>
    %35 = vector.shape_cast %34 : vector<1x8x128xf32> to vector<8x128xf32>
    %36 = arith.addf %35, %30 : vector<8x128xf32>
    %c2_i32_24 = arith.constant 2 : i32
    %37 = tpu.dynamic_rotate %36 by %c2_i32_24 dim 1 : vector<8x128xf32>, i32 -> vector<8x128xf32>
    %cst_25 = arith.constant 0.000000e+00 : f32
    %38 = vector.broadcast %cst_25 : f32 to vector<8x128xf32>
    %39 = arith.select %2, %37, %38 : vector<8x128xi1>, vector<8x128xf32>
    %c126_i32_26 = arith.constant 126 : i32
    %40 = tpu.dynamic_rotate %36 by %c126_i32_26 dim 1 : vector<8x128xf32>, i32 -> vector<8x128xf32>
    %cst_27 = arith.constant 0.000000e+00 : f32
    %41 = vector.broadcast %cst_27 : f32 to vector<8x128xf32>
    %42 = arith.select %4, %40, %41 : vector<8x128xi1>, vector<8x128xf32>
    %43 = tpu.concatenate %39, %36, %42 in 0 : vector<8x128xf32>, vector<8x128xf32>, vector<8x128xf32> -> vector<24x128xf32>
    %c1_28 = arith.constant 1 : index
    %c0_29 = arith.constant 0 : index
    %c0_30 = arith.constant 0 : index
    %44 = vector.load %arg1[%c1_28, %c0_29, %c0_30] : memref<3x8x24xf32, #tpu.memory_space<vmem>>, vector<1x8x24xf32>
    %45 = vector.shape_cast %44 : vector<1x8x24xf32> to vector<8x24xf32>
    %cst_31 = arith.constant dense<0.000000e+00> : vector<8x128xf32>
    %46 = tpu.matmul %45, %43, %cst_31 {dimension_numbers = #tpu.dot_dimension_numbers<[1], [0], [0], [1], [0, 0, 1, 1], [], []>} : vector<8x24xf32>, vector<24x128xf32>, vector<8x128xf32> -> vector<8x128xf32>
    %c1_32 = arith.constant 1 : index
    %c0_33 = arith.constant 0 : index
    %c0_34 = arith.constant 0 : index
    %47 = vector.load %arg2[%c1_32, %c0_33, %c0_34] : memref<3x8x1xf32, #tpu.memory_space<vmem>>, vector<1x8x1xf32>
    %48 = vector.shape_cast %47 : vector<1x8x1xf32> to vector<8x1xf32>
    %49 = vector.broadcast %48 : vector<8x1xf32> to vector<8x128xf32>
    %50 = arith.addf %46, %49 : vector<8x128xf32>
    %cst_35 = arith.constant 0.000000e+00 : f32
    %51 = vector.broadcast %cst_35 : f32 to vector<8x128xf32>
    %52 = arith.maximumf %50, %51 : vector<8x128xf32>
    %c1_36 = arith.constant 1 : index
    %c0_37 = arith.constant 0 : index
    %c0_38 = arith.constant 0 : index
    %53 = vector.load %arg3[%c1_36, %c0_37, %c0_38] : memref<3x8x1xf32, #tpu.memory_space<vmem>>, vector<1x8x1xf32>
    %54 = vector.shape_cast %53 : vector<1x8x1xf32> to vector<8x1xf32>
    %55 = vector.broadcast %54 : vector<8x1xf32> to vector<8x128xf32>
    %56 = arith.mulf %52, %55 : vector<8x128xf32>
    %c1_39 = arith.constant 1 : index
    %c0_40 = arith.constant 0 : index
    %c0_41 = arith.constant 0 : index
    %57 = vector.load %arg4[%c1_39, %c0_40, %c0_41] : memref<3x8x1xf32, #tpu.memory_space<vmem>>, vector<1x8x1xf32>
    %58 = vector.shape_cast %57 : vector<1x8x1xf32> to vector<8x1xf32>
    %59 = vector.broadcast %58 : vector<8x1xf32> to vector<8x128xf32>
    %60 = arith.addf %56, %59 : vector<8x128xf32>
    %c1_42 = arith.constant 1 : index
    %c0_43 = arith.constant 0 : index
    %c0_44 = arith.constant 0 : index
    %61 = vector.load %arg5[%c1_42, %c0_43, %c0_44] : memref<3x8x128xf32, #tpu.memory_space<vmem>>, vector<1x8x128xf32>
    %62 = vector.shape_cast %61 : vector<1x8x128xf32> to vector<8x128xf32>
    %63 = vector.shape_cast %60 : vector<8x128xf32> to vector<1x8x128xf32>
    tpu.vector_store %arg5[%c1_42, %c0_43, %c0_44], %63 {strides = array<i32>} : memref<3x8x128xf32, #tpu.memory_space<vmem>>, vector<1x8x128xf32>,
    %c2 = arith.constant 2 : index
    %c0_45 = arith.constant 0 : index
    %c0_46 = arith.constant 0 : index
    %64 = vector.load %arg0[%c2, %c0_45, %c0_46] : memref<3x8x128xf32, #tpu.memory_space<vmem>>, vector<1x8x128xf32>
    %65 = vector.shape_cast %64 : vector<1x8x128xf32> to vector<8x128xf32>
    %66 = arith.addf %65, %60 : vector<8x128xf32>
    %c2_i32_47 = arith.constant 2 : i32
    %67 = tpu.dynamic_rotate %66 by %c2_i32_47 dim 1 : vector<8x128xf32>, i32 -> vector<8x128xf32>
    %cst_48 = arith.constant 0.000000e+00 : f32
    %68 = vector.broadcast %cst_48 : f32 to vector<8x128xf32>
    %69 = arith.select %2, %67, %68 : vector<8x128xi1>, vector<8x128xf32>
    %c126_i32_49 = arith.constant 126 : i32
    %70 = tpu.dynamic_rotate %66 by %c126_i32_49 dim 1 : vector<8x128xf32>, i32 -> vector<8x128xf32>
    %cst_50 = arith.constant 0.000000e+00 : f32
    %71 = vector.broadcast %cst_50 : f32 to vector<8x128xf32>
    %72 = arith.select %4, %70, %71 : vector<8x128xi1>, vector<8x128xf32>
    %73 = tpu.concatenate %69, %66, %72 in 0 : vector<8x128xf32>, vector<8x128xf32>, vector<8x128xf32> -> vector<24x128xf32>
    %c2_51 = arith.constant 2 : index
    %c0_52 = arith.constant 0 : index
    %c0_53 = arith.constant 0 : index
    %74 = vector.load %arg1[%c2_51, %c0_52, %c0_53] : memref<3x8x24xf32, #tpu.memory_space<vmem>>, vector<1x8x24xf32>
    %75 = vector.shape_cast %74 : vector<1x8x24xf32> to vector<8x24xf32>
    %cst_54 = arith.constant dense<0.000000e+00> : vector<8x128xf32>
    %76 = tpu.matmul %75, %73, %cst_54 {dimension_numbers = #tpu.dot_dimension_numbers<[1], [0], [0], [1], [0, 0, 1, 1], [], []>} : vector<8x24xf32>, vector<24x128xf32>, vector<8x128xf32> -> vector<8x128xf32>
    %c2_55 = arith.constant 2 : index
    %c0_56 = arith.constant 0 : index
    %c0_57 = arith.constant 0 : index
    %77 = vector.load %arg2[%c2_55, %c0_56, %c0_57] : memref<3x8x1xf32, #tpu.memory_space<vmem>>, vector<1x8x1xf32>
    %78 = vector.shape_cast %77 : vector<1x8x1xf32> to vector<8x1xf32>
    %79 = vector.broadcast %78 : vector<8x1xf32> to vector<8x128xf32>
    %80 = arith.addf %76, %79 : vector<8x128xf32>
    %cst_58 = arith.constant 0.000000e+00 : f32
    %81 = vector.broadcast %cst_58 : f32 to vector<8x128xf32>
    %82 = arith.maximumf %80, %81 : vector<8x128xf32>
    %c2_59 = arith.constant 2 : index
    %c0_60 = arith.constant 0 : index
    %c0_61 = arith.constant 0 : index
    %83 = vector.load %arg3[%c2_59, %c0_60, %c0_61] : memref<3x8x1xf32, #tpu.memory_space<vmem>>, vector<1x8x1xf32>
    %84 = vector.shape_cast %83 : vector<1x8x1xf32> to vector<8x1xf32>
    %85 = vector.broadcast %84 : vector<8x1xf32> to vector<8x128xf32>
    %86 = arith.mulf %82, %85 : vector<8x128xf32>
    %c2_62 = arith.constant 2 : index
    %c0_63 = arith.constant 0 : index
    %c0_64 = arith.constant 0 : index
    %87 = vector.load %arg4[%c2_62, %c0_63, %c0_64] : memref<3x8x1xf32, #tpu.memory_space<vmem>>, vector<1x8x1xf32>
    %88 = vector.shape_cast %87 : vector<1x8x1xf32> to vector<8x1xf32>
    %89 = vector.broadcast %88 : vector<8x1xf32> to vector<8x128xf32>
    %90 = arith.addf %86, %89 : vector<8x128xf32>
    %c2_65 = arith.constant 2 : index
    %c0_66 = arith.constant 0 : index
    %c0_67 = arith.constant 0 : index
    %91 = vector.load %arg5[%c2_65, %c0_66, %c0_67] : memref<3x8x128xf32, #tpu.memory_space<vmem>>, vector<1x8x128xf32>
    %92 = vector.shape_cast %91 : vector<1x8x128xf32> to vector<8x128xf32>
    %93 = vector.shape_cast %90 : vector<8x128xf32> to vector<1x8x128xf32>
    tpu.vector_store %arg5[%c2_65, %c0_66, %c0_67], %93 {strides = array<i32>} : memref<3x8x128xf32, #tpu.memory_space<vmem>>, vector<1x8x128xf32>,
    return
  }
}

</mosaic_0001>

<bundles_post_ra>
// kernel: tpu_custom_call.1
= control target key start
LH: loop header
LB: loop body
LE: loop exit
PB: predicated region body
PF: predicated region fallthrough
CT: control target
= control target key end

     0   :  { %s455_s20 = smov 126   ;;  %v456_v1 = vmov 0.0   ;;  %vm457_vm0 = vmmov 0   ;;  %v458_v3 = vmov 0   ;;  %s581_s0 = inlined_call_operand.vmem [shape: f32[3,8,128], index: 0, kind: input, shape index: {}]   ;;  %s582_s1 = inlined_call_operand.vmem [shape: f32[3,8,24], index: 1, kind: input, shape index: {}]   ;;  %s583_s2 = inlined_call_operand.vmem [shape: f32[3,8,1], index: 2, kind: input, shape index: {}]   ;;  %s584_s3 = inlined_call_operand.vmem [shape: f32[3,8,1], index: 3, kind: input, shape index: {}]   ;;  %s585_s4 = inlined_call_operand.vmem [shape: f32[3,8,1], index: 4, kind: input, shape index: {}]   ;;  %s586_s5 = inlined_call_operand.hbm [shape: f32[3,8,128], index: 5, kind: output, shape index: {}]  }
   0x1   :  { %v25_v0 = vld [vmem:[%s581_s0] sm:$0xff]  ;;  %396 = vmatprep.subr.mxu0 %v456_v1  ;;  %402 = vmatprep.mubr.msk.f32.mxu0 %vm457_vm0, %v456_v1 }
   0x2   :  { %29 = vrot.lane.b32.xlu0 %v25_v0, %s455_s20  ;;  %v33_v2 = vld [vmem:[%s583_s2] sm:$0xff]  ;;  %431 = vset.pattern.permute.xlu1 %v458_v3 }
   0x3   :  { %10 = vsyncpa [#allocation3], 0  ;;  %36 = vperm.xlu1 %431, %v33_v2   ;;  %432 = vset.pattern.permute.xlu0 %v458_v3  ;;  %v114_v4 = vld [vmem:[%s584_s3] sm:$0xff]  ;;  %s459_s25 = smov 2   ;;  %v370_v6 = vld [vmem:[%s583_s2 + $0x8] sm:$0xff]  ;;  %v21_v8 = vlaneseq  ;;  %vm39_vm3 = vcmask 195584  }
   0x4   :  { %405 = vmatprep.subr.mxu1 %v456_v1  ;;  %411 = vmatprep.mubr.msk.f32.mxu1 %vm457_vm0, %v456_v1  ;;  %v121_v5 = vld [vmem:[%s585_s4] sm:$0xff]  ;;  %v375_v7 = vld [vmem:[%s585_s4 + $0x8] sm:$0xff]  ;;  %v376_v36 = vld [vmem:[%s581_s0 + $0x10] sm:$0xff] }
   0x5   :  { %v519_v9 = vand.u32 127, %v21_v8  ;;  %v32_v11 = vld [vmem:[%s582_s1] sm:$0xff]  ;;  %v368_v21 = vld [vmem:[%s581_s0 + $0x8] sm:$0xff]  ;;  %v382_v39 = vld [vmem:[%s584_s3 + $0x10] sm:$0xff] }
   0x6   :  { %26 = vrot.lane.b32.xlu0 %v25_v0, %s459_s25  ;;  %v374_v24 = vld [vmem:[%s584_s3 + $0x8] sm:$0xff]  ;;  %v378_v40 = vld [vmem:[%s583_s2 + $0x10] sm:$0xff]  ;;  %s460_s2 = smov [#allocation2]  }
   0x7   :  { %117 = vperm.xlu1 %431, %v114_v4   ;;  %vm24_vm1 = vcmp.lt.s32.totalorder %v519_v9, 126  ;;  %vm23_vm2 = vcmp.ge.s32.totalorder %v519_v9, 2  ;;  %v369_v26 = vld [vmem:[%s582_s1 + $0x8] sm:$0xff]  ;;  %v383_v41 = vld [vmem:[%s585_s4 + $0x10] sm:$0xff]  ;;  %s354_s4 = sshll.u32 %s460_s2, 4  ;;  %s355_s4 = int_to_ptr.vmem [resolvable:$true] %s354_s4 }
   0x8   :  { %v377_v43 = vld [vmem:[%s582_s1 + $0x10] sm:$0xff]  ;;  %s433_s1 = scalar_lea.vmem %s355_s4, 384  ;;  %p438_p1 = scmp.lt.s32.totalorder %s355_s4, %s355_s4 }
   0x9   :  { %p434_p0 = scmp.ne.s32.totalorder %s355_s4, %s433_s1  ;;  %p439_p2 = scmp.lt.s32.totalorder %s433_s1, %s433_s1 }
   0xa   :  { %124 = vperm.xlu0 %432, %v121_v5  }
   0xb   :  { %p440_p3 = por %p439_p2, %p438_p1 }
   0xd   :  { %p441_p4 = pnand %p440_p3, %p434_p0 }
   0xe   :  { %144 = vperm.xlu0 %432, %v370_v6  }
  0x12   :  { %233 = vperm.xlu0 %432, %v375_v7  }
  0x74   :  { %v30_v10 = vpop.permute.xlu0 %29 }
  0x75   :  { %397 = vmatpush3.msk.msra.mxu0 %vm24_vm1, %v30_v10 }
  0x76   :  { %398 = vmatprep.subr.mxu0 %v456_v1 }
  0x77   :  { %399 = vmatpush3.msra.mxu0 %v25_v0 }
  0x78   :  { %v27_v12 = vpop.permute.xlu0 %26  ;;  %400 = vmatprep.subr.mxu0 %v456_v1 }
  0x79   :  { %401 = vmatpush3.msk.msra.mxu0 %vm23_vm2, %v27_v12 }
  0x7a   :  { %403 = vmatmul.mubr.msk.f32.vlgmr.msra.gmra.mxu0 %vm39_vm3, %v32_v11  ;;  %414 = vmatprep.subr.mxu0 %v456_v1 }
  0x7b   :  { %420 = vmatprep.mubr.msk.f32.mxu0 %vm457_vm0, %v456_v1 }
  0x7e   :  { %v37_v13 = vpop.permute.xlu1 %36 }
  0x82   :  { %v118_v18 = vpop.permute.xlu1 %117 }
  0x85   :  { %v125_v20 = vpop.permute.xlu0 %124 }
  0x89   :  { %v145_v28 = vpop.permute.xlu0 %144 }
  0x8d   :  { %v234_v35 = vpop.permute.xlu0 %233 }
 0x13a   :  { %v109_v14 = vpop.f32.mrf.mxu0 }
 0x13b   :  { %v110_v15 = vadd.f32 %v109_v14, %v37_v13 }
 0x13c   :  { %v404_v16 = vpop.f32.mrf.mxu0 }
 0x13d   :  { %v113_v17 = vmax.f32 %v110_v15, 0.0 }
 0x13f   :  { %v120_v19 = vmul.f32 %v118_v18, %v113_v17 }
 0x141   :  { %v127_v22 = vadd.f32 %v125_v20, %v120_v19 }
 0x143   :  { %128 = vst [vmem:[#allocation2] sm:$0xff] %v127_v22  ;;  %v131_v23 = vadd.f32 %v368_v21, %v127_v22 }
 0x145   :  { %135 = vrot.lane.b32.xlu1 %v131_v23, %s455_s20 }
 0x149   :  { %132 = vrot.lane.b32.xlu1 %v131_v23, %s459_s25 }
 0x14d   :  { %225 = vperm.xlu1 %431, %v374_v24  }
 0x1b7   :  { %v136_v25 = vpop.permute.xlu1 %135 }
 0x1b8   :  { %406 = vmatpush3.msk.msra.mxu1 %vm24_vm1, %v136_v25 }
 0x1b9   :  { %407 = vmatprep.subr.mxu1 %v456_v1 }
 0x1ba   :  { %408 = vmatpush3.msra.mxu1 %v131_v23 }
 0x1bb   :  { %409 = vmatprep.subr.mxu1 %v456_v1  ;;  %v133_v27 = vpop.permute.xlu1 %132 }
 0x1bc   :  { %410 = vmatpush3.msk.msra.mxu1 %vm23_vm2, %v133_v27 }
 0x1bd   :  { %412 = vmatmul.mubr.msk.f32.vlgmr.msra.gmra.mxu1 %vm39_vm3, %v369_v26 }
 0x1c8   :  { %v226_v33 = vpop.permute.xlu1 %225 }
 0x27d   :  { %v216_v29 = vpop.f32.mrf.mxu1 }
 0x27e   :  { %v217_v30 = vadd.f32 %v216_v29, %v145_v28 }
 0x27f   :  { %v413_v31 = vpop.f32.mrf.mxu1 }
 0x280   :  { %v220_v32 = vmax.f32 %v217_v30, 0.0 }
 0x282   :  { %v228_v34 = vmul.f32 %v226_v33, %v220_v32 }
 0x284   :  { %v236_v37 = vadd.f32 %v234_v35, %v228_v34 }
 0x286   :  { %238 = vst [vmem:[#allocation2 + $0x8] sm:$0xff] %v236_v37  ;;  %v241_v38 = vadd.f32 %v376_v36, %v236_v37 }
 0x288   :  { %242 = vrot.lane.b32.xlu0 %v241_v38, %s459_s25  ;;  %245 = vrot.lane.b32.xlu1 %v241_v38, %s455_s20 }
 0x28c   :  { %335 = vperm.xlu0 %432, %v382_v39   ;;  %254 = vperm.xlu1 %431, %v378_v40  }
 0x290   :  { %343 = vperm.xlu1 %431, %v383_v41  }
 0x2fa   :  { %v246_v42 = vpop.permute.xlu1 %245  ;;  %v243_v44 = vpop.permute.xlu0 %242 }
 0x2fb   :  { %415 = vmatpush3.msk.msra.mxu0 %vm24_vm1, %v246_v42 }
 0x2fc   :  { %416 = vmatprep.subr.mxu0 %v456_v1 }
 0x2fd   :  { %417 = vmatpush3.msra.mxu0 %v241_v38 }
 0x2fe   :  { %418 = vmatprep.subr.mxu0 %v456_v1 }
 0x2ff   :  { %419 = vmatpush3.msk.msra.mxu0 %vm23_vm2, %v243_v44 }
 0x300   :  { %421 = vmatmul.mubr.msk.f32.vlgmr.msra.gmra.mxu0 %vm39_vm3, %v377_v43 }
 0x307   :  { %v255_v45 = vpop.permute.xlu1 %254  ;;  %v336_v50 = vpop.permute.xlu0 %335 }
 0x30b   :  { %v344_v52 = vpop.permute.xlu1 %343 }
 0x3c0   :  { %v326_v46 = vpop.f32.mrf.mxu0 }
 0x3c1   :  { %v327_v47 = vadd.f32 %v326_v46, %v255_v45 }
 0x3c2   :  { %v422_v48 = vpop.f32.mrf.mxu0 }
 0x3c3   :  { %v330_v49 = vmax.f32 %v327_v47, 0.0 }
 0x3c5   :  { %v338_v51 = vmul.f32 %v336_v50, %v330_v49 }
 0x3c7   :  { %v346_v53 = vadd.f32 %v344_v52, %v338_v51 }
 0x3c9   :  { %348 = vst [vmem:[#allocation2 + $0x10] sm:$0xff] %v346_v53 }
 0x3ca   :  { %444 = shalt.err (!%p441_p4)
}
 0x3cb   :  { %s461_s20 = smov 128   ;;  %s462_s24 = smov 8  }
 0x3cc   :  { %360 = dma.vmem_to_hbm [thread:$0]  %s355_s4, 384, %s586_s5, [#allocation3], %s461_s20, %s461_s20, %s462_s24  }
 0x3cd   :  { %453 = dma.done.wait [#allocation3], 384  }
 0x3ce   :  { %454 = vsyncadd [#allocation3], 4294966912 }
 0x3cf   :  { %364 = vsyncpa [#allocation3], 1 }

</bundles_post_ra>
